<compile_context>
chip_gen: v7x
topology: tpu7x:2x2x1
jax: 0.10.0
libtpu: 0.0.40
codegen_flags: <defaults>
</compile_context>

<pallas_src>
from functools import partial

import numpy as np
import jax
import jax.numpy as jnp
from jax.experimental import pallas as pl
from jax.experimental.pallas import tpu as pltpu  # noqa: F401  (kept for TPU backend import)

L = 8                  # lattice extent (fixed by the module: basis is (K, 8, 8, 2))
LANES = L * L * 2      # 128 = (Lx, Ly, spin) flattened row-major -> full lane width


def dd_kernel(chi_r_ref, chi_i_ref, u_r_ref, u_i_ref, out_r_ref, out_i_ref, *, kappa):
    # chi_*: (5, R, 128)  row 0 = psi, rows 1..4 = gamma-projected shifted psi
    #                     [(I-g0)psi(n+0), (I+g0)psi(n-0), (I-g1)psi(n+1), (I+g1)psi(n-1)]
    # u_*  : (4, R, 128)  matching spin-expanded gauge links
    #                     [U_0(n), conj(U_0(n-0)), U_1(n), conj(U_1(n-1))]
    # out_*: (R, 128)     D @ psi, real / imag       (R = B * K, one row per (b, k))
    psi_r = chi_r_ref[0]
    psi_i = chi_i_ref[0]

    acc_r = jnp.zeros_like(psi_r)
    acc_i = jnp.zeros_like(psi_i)
    for t in range(4):                       # static, fully unrolled; 4 complex FMAs
        cr = chi_r_ref[t + 1]
        ci = chi_i_ref[t + 1]
        ur = u_r_ref[t]
        ui = u_i_ref[t]
        acc_r = acc_r + (ur * cr - ui * ci)
        acc_i = acc_i + (ur * ci + ui * cr)

    out_r_ref[...] = psi_r - kappa * acc_r
    out_i_ref[...] = psi_i - kappa * acc_i


def dd_approx_forward(basis_real, basis_imag, U1, kappa=0.276):
    """Pallas implementation of DDApprox.forward.

    basis_real, basis_imag : (K, L, L, 2) float32
    U1                     : (B, 2, L, L) complex64
    returns                : (B, K, L*L*2) complex64
    """
    K = basis_real.shape[0]
    B = U1.shape[0]
    R = B * K

    basis = basis_real.astype(jnp.complex64) + 1j * basis_imag.astype(jnp.complex64)  # (K,L,L,2)

    g0 = jnp.array([[0, 1], [1, 0]], dtype=jnp.complex64)
    g1 = jnp.array([[0, -1j], [1j, 0]], dtype=jnp.complex64)
    I2 = jnp.eye(2, dtype=jnp.complex64)

    # ---- batch-independent preprocessing (hoisted out of the kernel) ----
    # Gauge links are spin-diagonal scalars, so (I +/- g_mu) commutes with them:
    # apply the gamma projections to the shifted basis once, here.
    chis = [basis]
    for mu, g in enumerate((g0, g1)):
        pf = jnp.roll(basis, -1, axis=1 + mu)          # psi(n + mu)
        pb = jnp.roll(basis, +1, axis=1 + mu)          # psi(n - mu)
        chis.append(jnp.einsum('st,klmt->klms', I2 - g, pf))
        chis.append(jnp.einsum('st,klmt->klms', I2 + g, pb))
    chi = jnp.stack(chis, axis=0).reshape(5, K, LANES)                      # (5, K, 128)
    chi = jnp.broadcast_to(chi[:, None], (5, B, K, LANES)).reshape(5, R, LANES)

    # ---- gauge links: back-shift + conj precomputed, spin-expanded, row-broadcast ----
    us = []
    for mu in range(2):
        u_mu = U1[:, mu]                                                    # (B, L, L)
        ub_mu = jnp.conj(jnp.roll(u_mu, 1, axis=1 + mu))                    # conj(U_mu(n - mu))
        us.append(u_mu)
        us.append(ub_mu)
    u = jnp.stack(us, axis=0)                                               # (4, B, L, L)
    u = jnp.broadcast_to(u[..., None], (4, B, L, L, 2)).reshape(4, B, LANES)
    u = jnp.broadcast_to(u[:, :, None], (4, B, K, LANES)).reshape(4, R, LANES)

    chi_r = jnp.real(chi).astype(jnp.float32)
    chi_i = jnp.imag(chi).astype(jnp.float32)
    u_r = jnp.real(u).astype(jnp.float32)
    u_i = jnp.imag(u).astype(jnp.float32)

    # Single invocation, whole problem resident in VMEM; output last dim = 128
    # exactly -> dense, unmasked stores.
    out_r, out_i = pl.pallas_call(
        partial(dd_kernel, kappa=kappa),
        out_shape=(
            jax.ShapeDtypeStruct((R, LANES), jnp.float32),
            jax.ShapeDtypeStruct((R, LANES), jnp.float32),
        ),
    )(chi_r, chi_i, u_r, u_i)

    # row index = b * K + k, lane index = (x*L + y)*2 + s  ==  torch .reshape(B, -1)
    return jax.lax.complex(out_r, out_i).reshape(B, K, LANES)


# ---------------- pure-JAX reference (mirrors the PyTorch module) --------------

def _apply_proj(h, P):
    return jnp.stack(
        [P[0, 0] * h[..., 0] + P[0, 1] * h[..., 1],
         P[1, 0] * h[..., 0] + P[1, 1] * h[..., 1]],
        axis=-1,
    )


def ddopt_reference(psi, U1, kappa=0.276):
    # psi: (1, L, L, 2) complex64, U1: (B, 2, L, L) complex64 -> (B, L, L, 2)
    B = U1.shape[0]
    p = jnp.broadcast_to(psi, (B, L, L, 2))
    g0 = jnp.array([[0, 1], [1, 0]], dtype=jnp.complex64)
    g1 = jnp.array([[0, -1j], [1j, 0]], dtype=jnp.complex64)
    I2 = jnp.eye(2, dtype=jnp.complex64)
    gammas = (g0, g1)
    hop = jnp.zeros_like(p)
    for mu in range(2):
        ax = 1 + mu
        u = U1[:, mu][..., None]
        u_back = jnp.roll(U1[:, mu], 1, axis=1 + mu)[..., None]
        pf = jnp.roll(p, -1, axis=ax)
        pb = jnp.roll(p, 1, axis=ax)
        hop = hop + _apply_proj(u * pf, I2 - gammas[mu]) \
                  + _apply_proj(jnp.conj(u_back) * pb, I2 + gammas[mu])
    return p - kappa * hop


def dd_approx_reference(basis_real, basis_imag, U1, kappa=0.276):
    basis = basis_real.astype(jnp.complex64) + 1j * basis_imag.astype(jnp.complex64)
    outs = []
    for i in range(basis.shape[0]):
        o = ddopt_reference(basis[i:i + 1], U1, kappa)
        outs.append(o.reshape(U1.shape[0], -1))
    return jnp.stack(outs, axis=1)


if __name__ == "__main__":
    key = jax.random.PRNGKey(0)
    k1, k2, k3 = jax.random.split(key, 3)

    basis_size = 4   # K
    batch = 2        # B

    # deterministic "parameters" (module __init__: randn(basis_size, 8, 8, 2))
    basis_real = jax.random.normal(k1, (basis_size, L, L, 2), dtype=jnp.float32)
    basis_imag = jax.random.normal(k2, (basis_size, L, L, 2), dtype=jnp.float32)

    # U(1) gauge field: unit-modulus complex links, shape (B, 2, L, L)
    theta = jax.random.uniform(k3, (batch, 2, L, L), dtype=jnp.float32,
                               minval=-np.pi, maxval=np.pi)
    U1 = jnp.exp(1j * theta.astype(jnp.complex64))

    out = dd_approx_forward(basis_real, basis_imag, U1)
    out = jax.block_until_ready(out)

    ref = dd_approx_reference(basis_real, basis_imag, U1)
    assert out.shape == (batch, basis_size, L * L * 2)
    assert out.dtype == jnp.complex64
    np.testing.assert_allclose(np.asarray(out), np.asarray(ref),
                               rtol=1e-4, atol=1e-4)
    print("KERNEL_OK")
</pallas_src>

<mosaic_0001>
module attributes {stable_mosaic.version = 11 : i64} {
  func.func @dd_kernel(%arg0: memref<5x8x128xf32, #tpu.memory_space<vmem>>, %arg1: memref<5x8x128xf32, #tpu.memory_space<vmem>>, %arg2: memref<4x8x128xf32, #tpu.memory_space<vmem>>, %arg3: memref<4x8x128xf32, #tpu.memory_space<vmem>>, %arg4: memref<8x128xf32, #tpu.memory_space<vmem>>, %arg5: memref<8x128xf32, #tpu.memory_space<vmem>>) attributes {dimension_semantics = [], scalar_prefetch = 0 : i64, scratch_operands = 0 : i64, tpu.core_type = #tpu.core_type<tc>} {
    %c0 = arith.constant 0 : index
    %c0_0 = arith.constant 0 : index
    %c0_1 = arith.constant 0 : index
    %0 = vector.load %arg0[%c0, %c0_0, %c0_1] : memref<5x8x128xf32, #tpu.memory_space<vmem>>, vector<1x8x128xf32>
    %1 = vector.shape_cast %0 : vector<1x8x128xf32> to vector<8x128xf32>
    %c0_2 = arith.constant 0 : index
    %c0_3 = arith.constant 0 : index
    %c0_4 = arith.constant 0 : index
    %2 = vector.load %arg1[%c0_2, %c0_3, %c0_4] : memref<5x8x128xf32, #tpu.memory_space<vmem>>, vector<1x8x128xf32>
    %3 = vector.shape_cast %2 : vector<1x8x128xf32> to vector<8x128xf32>
    %cst = arith.constant 0.000000e+00 : f32
    %4 = vector.broadcast %cst : f32 to vector<8x128xf32>
    %cst_5 = arith.constant 0.000000e+00 : f32
    %5 = vector.broadcast %cst_5 : f32 to vector<8x128xf32>
    %c1 = arith.constant 1 : index
    %c0_6 = arith.constant 0 : index
    %c0_7 = arith.constant 0 : index
    %6 = vector.load %arg0[%c1, %c0_6, %c0_7] : memref<5x8x128xf32, #tpu.memory_space<vmem>>, vector<1x8x128xf32>
    %7 = vector.shape_cast %6 : vector<1x8x128xf32> to vector<8x128xf32>
    %c1_8 = arith.constant 1 : index
    %c0_9 = arith.constant 0 : index
    %c0_10 = arith.constant 0 : index
    %8 = vector.load %arg1[%c1_8, %c0_9, %c0_10] : memref<5x8x128xf32, #tpu.memory_space<vmem>>, vector<1x8x128xf32>
    %9 = vector.shape_cast %8 : vector<1x8x128xf32> to vector<8x128xf32>
    %c0_11 = arith.constant 0 : index
    %c0_12 = arith.constant 0 : index
    %c0_13 = arith.constant 0 : index
    %10 = vector.load %arg2[%c0_11, %c0_12, %c0_13] : memref<4x8x128xf32, #tpu.memory_space<vmem>>, vector<1x8x128xf32>
    %11 = vector.shape_cast %10 : vector<1x8x128xf32> to vector<8x128xf32>
    %c0_14 = arith.constant 0 : index
    %c0_15 = arith.constant 0 : index
    %c0_16 = arith.constant 0 : index
    %12 = vector.load %arg3[%c0_14, %c0_15, %c0_16] : memref<4x8x128xf32, #tpu.memory_space<vmem>>, vector<1x8x128xf32>
    %13 = vector.shape_cast %12 : vector<1x8x128xf32> to vector<8x128xf32>
    %14 = arith.mulf %11, %7 : vector<8x128xf32>
    %15 = arith.mulf %13, %9 : vector<8x128xf32>
    %16 = arith.subf %14, %15 : vector<8x128xf32>
    %17 = arith.addf %4, %16 : vector<8x128xf32>
    %18 = arith.mulf %11, %9 : vector<8x128xf32>
    %19 = arith.mulf %13, %7 : vector<8x128xf32>
    %20 = arith.addf %18, %19 : vector<8x128xf32>
    %21 = arith.addf %5, %20 : vector<8x128xf32>
    %c2 = arith.constant 2 : index
    %c0_17 = arith.constant 0 : index
    %c0_18 = arith.constant 0 : index
    %22 = vector.load %arg0[%c2, %c0_17, %c0_18] : memref<5x8x128xf32, #tpu.memory_space<vmem>>, vector<1x8x128xf32>
    %23 = vector.shape_cast %22 : vector<1x8x128xf32> to vector<8x128xf32>
    %c2_19 = arith.constant 2 : index
    %c0_20 = arith.constant 0 : index
    %c0_21 = arith.constant 0 : index
    %24 = vector.load %arg1[%c2_19, %c0_20, %c0_21] : memref<5x8x128xf32, #tpu.memory_space<vmem>>, vector<1x8x128xf32>
    %25 = vector.shape_cast %24 : vector<1x8x128xf32> to vector<8x128xf32>
    %c1_22 = arith.constant 1 : index
    %c0_23 = arith.constant 0 : index
    %c0_24 = arith.constant 0 : index
    %26 = vector.load %arg2[%c1_22, %c0_23, %c0_24] : memref<4x8x128xf32, #tpu.memory_space<vmem>>, vector<1x8x128xf32>
    %27 = vector.shape_cast %26 : vector<1x8x128xf32> to vector<8x128xf32>
    %c1_25 = arith.constant 1 : index
    %c0_26 = arith.constant 0 : index
    %c0_27 = arith.constant 0 : index
    %28 = vector.load %arg3[%c1_25, %c0_26, %c0_27] : memref<4x8x128xf32, #tpu.memory_space<vmem>>, vector<1x8x128xf32>
    %29 = vector.shape_cast %28 : vector<1x8x128xf32> to vector<8x128xf32>
    %30 = arith.mulf %27, %23 : vector<8x128xf32>
    %31 = arith.mulf %29, %25 : vector<8x128xf32>
    %32 = arith.subf %30, %31 : vector<8x128xf32>
    %33 = arith.addf %17, %32 : vector<8x128xf32>
    %34 = arith.mulf %27, %25 : vector<8x128xf32>
    %35 = arith.mulf %29, %23 : vector<8x128xf32>
    %36 = arith.addf %34, %35 : vector<8x128xf32>
    %37 = arith.addf %21, %36 : vector<8x128xf32>
    %c3 = arith.constant 3 : index
    %c0_28 = arith.constant 0 : index
    %c0_29 = arith.constant 0 : index
    %38 = vector.load %arg0[%c3, %c0_28, %c0_29] : memref<5x8x128xf32, #tpu.memory_space<vmem>>, vector<1x8x128xf32>
    %39 = vector.shape_cast %38 : vector<1x8x128xf32> to vector<8x128xf32>
    %c3_30 = arith.constant 3 : index
    %c0_31 = arith.constant 0 : index
    %c0_32 = arith.constant 0 : index
    %40 = vector.load %arg1[%c3_30, %c0_31, %c0_32] : memref<5x8x128xf32, #tpu.memory_space<vmem>>, vector<1x8x128xf32>
    %41 = vector.shape_cast %40 : vector<1x8x128xf32> to vector<8x128xf32>
    %c2_33 = arith.constant 2 : index
    %c0_34 = arith.constant 0 : index
    %c0_35 = arith.constant 0 : index
    %42 = vector.load %arg2[%c2_33, %c0_34, %c0_35] : memref<4x8x128xf32, #tpu.memory_space<vmem>>, vector<1x8x128xf32>
    %43 = vector.shape_cast %42 : vector<1x8x128xf32> to vector<8x128xf32>
    %c2_36 = arith.constant 2 : index
    %c0_37 = arith.constant 0 : index
    %c0_38 = arith.constant 0 : index
    %44 = vector.load %arg3[%c2_36, %c0_37, %c0_38] : memref<4x8x128xf32, #tpu.memory_space<vmem>>, vector<1x8x128xf32>
    %45 = vector.shape_cast %44 : vector<1x8x128xf32> to vector<8x128xf32>
    %46 = arith.mulf %43, %39 : vector<8x128xf32>
    %47 = arith.mulf %45, %41 : vector<8x128xf32>
    %48 = arith.subf %46, %47 : vector<8x128xf32>
    %49 = arith.addf %33, %48 : vector<8x128xf32>
    %50 = arith.mulf %43, %41 : vector<8x128xf32>
    %51 = arith.mulf %45, %39 : vector<8x128xf32>
    %52 = arith.addf %50, %51 : vector<8x128xf32>
    %53 = arith.addf %37, %52 : vector<8x128xf32>
    %c4 = arith.constant 4 : index
    %c0_39 = arith.constant 0 : index
    %c0_40 = arith.constant 0 : index
    %54 = vector.load %arg0[%c4, %c0_39, %c0_40] : memref<5x8x128xf32, #tpu.memory_space<vmem>>, vector<1x8x128xf32>
    %55 = vector.shape_cast %54 : vector<1x8x128xf32> to vector<8x128xf32>
    %c4_41 = arith.constant 4 : index
    %c0_42 = arith.constant 0 : index
    %c0_43 = arith.constant 0 : index
    %56 = vector.load %arg1[%c4_41, %c0_42, %c0_43] : memref<5x8x128xf32, #tpu.memory_space<vmem>>, vector<1x8x128xf32>
    %57 = vector.shape_cast %56 : vector<1x8x128xf32> to vector<8x128xf32>
    %c3_44 = arith.constant 3 : index
    %c0_45 = arith.constant 0 : index
    %c0_46 = arith.constant 0 : index
    %58 = vector.load %arg2[%c3_44, %c0_45, %c0_46] : memref<4x8x128xf32, #tpu.memory_space<vmem>>, vector<1x8x128xf32>
    %59 = vector.shape_cast %58 : vector<1x8x128xf32> to vector<8x128xf32>
    %c3_47 = arith.constant 3 : index
    %c0_48 = arith.constant 0 : index
    %c0_49 = arith.constant 0 : index
    %60 = vector.load %arg3[%c3_47, %c0_48, %c0_49] : memref<4x8x128xf32, #tpu.memory_space<vmem>>, vector<1x8x128xf32>
    %61 = vector.shape_cast %60 : vector<1x8x128xf32> to vector<8x128xf32>
    %62 = arith.mulf %59, %55 : vector<8x128xf32>
    %63 = arith.mulf %61, %57 : vector<8x128xf32>
    %64 = arith.subf %62, %63 : vector<8x128xf32>
    %65 = arith.addf %49, %64 : vector<8x128xf32>
    %66 = arith.mulf %59, %57 : vector<8x128xf32>
    %67 = arith.mulf %61, %55 : vector<8x128xf32>
    %68 = arith.addf %66, %67 : vector<8x128xf32>
    %69 = arith.addf %53, %68 : vector<8x128xf32>
    %cst_50 = arith.constant 2.760000e-01 : f32
    %70 = vector.broadcast %cst_50 : f32 to vector<8x128xf32>
    %71 = arith.mulf %70, %65 : vector<8x128xf32>
    %72 = arith.subf %1, %71 : vector<8x128xf32>
    %c0_51 = arith.constant 0 : index
    %c0_52 = arith.constant 0 : index
    %73 = vector.load %arg4[%c0_51, %c0_52] : memref<8x128xf32, #tpu.memory_space<vmem>>, vector<8x128xf32>
    tpu.vector_store %arg4[%c0_51, %c0_52], %72 {strides = array<i32>} : memref<8x128xf32, #tpu.memory_space<vmem>>, vector<8x128xf32>,
    %cst_53 = arith.constant 2.760000e-01 : f32
    %74 = vector.broadcast %cst_53 : f32 to vector<8x128xf32>
    %75 = arith.mulf %74, %69 : vector<8x128xf32>
    %76 = arith.subf %3, %75 : vector<8x128xf32>
    %c0_54 = arith.constant 0 : index
    %c0_55 = arith.constant 0 : index
    %77 = vector.load %arg5[%c0_54, %c0_55] : memref<8x128xf32, #tpu.memory_space<vmem>>, vector<8x128xf32>
    tpu.vector_store %arg5[%c0_54, %c0_55], %76 {strides = array<i32>} : memref<8x128xf32, #tpu.memory_space<vmem>>, vector<8x128xf32>,
    return
  }
}

</mosaic_0001>

<bundles_post_ra>
// kernel: tpu_custom_call.1
= control target key start
LH: loop header
LB: loop body
LE: loop exit
PB: predicated region body
PF: predicated region fallthrough
CT: control target
= control target key end

     0   :  { %11 = vsyncpa [#allocation3], 0  ;;  %s463_s0 = inlined_call_operand.hbm [shape: f32[5,8,128], index: 0, kind: input, shape index: {}]   ;;  %s464_s1 = inlined_call_operand.hbm [shape: f32[5,8,128], index: 1, kind: input, shape index: {}]   ;;  %s465_s2 = inlined_call_operand.hbm [shape: f32[4,8,128], index: 2, kind: input, shape index: {}]   ;;  %s466_s3 = inlined_call_operand.hbm [shape: f32[4,8,128], index: 3, kind: input, shape index: {}]   ;;  %s467_s4 = inlined_call_operand.hbm [shape: f32[8,128], index: 4, kind: output, shape index: {0}]   ;;  %s468_s5 = inlined_call_operand.hbm [shape: f32[8,128], index: 5, kind: output, shape index: {1}]  }
   0x1   :  { %12 = vsyncpa [#allocation6], 0 }
   0x2   :  { %13 = vsyncpa [#allocation9], 0 }
   0x3   :  { %14 = vsyncpa [#allocation4], 0 }
   0x4   :  { %15 = vsyncpa [#allocation12], 0  ;;  %s327_s18 = smov [#allocation5]   ;;  %s328_s20 = smov [#allocation2]  }
   0x5   :  { %s33_s19 = sshll.u32 %s327_s18, 4  ;;  %s21_s21 = sshll.u32 %s328_s20, 4  ;;  %s34_s19 = int_to_ptr.vmem [resolvable:$true] %s33_s19  ;;  %s365_s21 = int_to_ptr.vmem [resolvable:$true] %s21_s21 }
   0x6   :  { %s185_s24 = scalar_lea.hbm %s464_s1, 640 }
   0x7   :  { %p186_p0 = scmp.ne.s32.totalorder %s464_s1, %s185_s24  ;;  %p189_p1 = scmp.lt.u32.totalorder %s185_s24, %s464_s1 }
   0x9   :  { %p191_p2 = pnand %p189_p1, %p186_p0 }
   0xb   :  { %194 = shalt.err (!%p191_p2)
}
   0xc   :  { %s195_s29 = scalar_lea.vmem %s34_s19, 640  ;;  %p200_p4 = scmp.lt.s32.totalorder %s34_s19, %s34_s19 }
   0xd   :  { %p196_p3 = scmp.ne.s32.totalorder %s34_s19, %s195_s29  ;;  %p201_p5 = scmp.lt.s32.totalorder %s195_s29, %s195_s29 }
   0xf   :  { %p202_p6 = por %p201_p5, %p200_p4 }
  0x11   :  { %p203_p7 = pnand %p202_p6, %p196_p3 }
  0x13   :  { %206 = shalt.err (!%p203_p7)
}
  0x14   :  { %s329_s30 = smov 128   ;;  %s330_s6 = smov 8  }
  0x15   :  { %39 = dma.hbm_to_vmem [thread:$0]  %s464_s1, 640, %s34_s19, [#allocation6], %s329_s30, %s329_s30, %s330_s6  }
  0x16   :  { %s207_s11 = scalar_lea.hbm %s463_s0, 640 }
  0x17   :  { %p208_p8 = scmp.ne.s32.totalorder %s463_s0, %s207_s11  ;;  %p211_p9 = scmp.lt.u32.totalorder %s207_s11, %s463_s0 }
  0x19   :  { %p213_p10 = pnand %p211_p9, %p208_p8 }
  0x1b   :  { %216 = shalt.err (!%p213_p10)
}
  0x1c   :  { %s217_s16 = scalar_lea.vmem %s365_s21, 640  ;;  %p222_p12 = scmp.lt.s32.totalorder %s365_s21, %s365_s21 }
  0x1d   :  { %p218_p11 = scmp.ne.s32.totalorder %s365_s21, %s217_s16  ;;  %p223_p13 = scmp.lt.s32.totalorder %s217_s16, %s217_s16 }
  0x1f   :  { %p224_p0 = por %p223_p13, %p222_p12 }
  0x21   :  { %p225_p1 = pnand %p224_p0, %p218_p11 }
  0x23   :  { %228 = shalt.err (!%p225_p1)
}
  0x24   :  { %27 = dma.hbm_to_vmem [thread:$0]  %s463_s0, 640, %s365_s21, [#allocation3], %s329_s30, %s329_s30, %s330_s6  }
  0x25   :  { %s331_s18 = smov [#allocation7]   ;;  %s332_s20 = smov [#allocation8]  }
  0x26   :  { %s45_s19 = sshll.u32 %s331_s18, 4  ;;  %s57_s22 = sshll.u32 %s332_s20, 4  ;;  %s46_s19 = int_to_ptr.vmem [resolvable:$true] %s45_s19  ;;  %s402_s22 = int_to_ptr.vmem [resolvable:$true] %s57_s22 }
  0x27   :  { %s229_s25 = scalar_lea.hbm %s465_s2, 512 }
  0x28   :  { %p230_p2 = scmp.ne.s32.totalorder %s465_s2, %s229_s25  ;;  %p233_p3 = scmp.lt.u32.totalorder %s229_s25, %s465_s2 }
  0x2a   :  { %p235_p4 = pnand %p233_p3, %p230_p2 }
  0x2c   :  { %238 = shalt.err (!%p235_p4)
}
  0x2d   :  { %s239_s0 = scalar_lea.vmem %s46_s19, 512  ;;  %p244_p6 = scmp.lt.s32.totalorder %s46_s19, %s46_s19 }
  0x2e   :  { %p240_p5 = scmp.ne.s32.totalorder %s46_s19, %s239_s0  ;;  %p245_p7 = scmp.lt.s32.totalorder %s239_s0, %s239_s0 }
  0x30   :  { %p246_p8 = por %p245_p7, %p244_p6 }
  0x32   :  { %p247_p9 = pnand %p246_p8, %p240_p5 }
  0x34   :  { %250 = shalt.err (!%p247_p9)
}
  0x35   :  { %51 = dma.hbm_to_vmem [thread:$0]  %s465_s2, 512, %s46_s19, [#allocation6], %s329_s30, %s329_s30, %s330_s6  }
  0x36   :  { %s251_s10 = scalar_lea.hbm %s466_s3, 512 }
  0x37   :  { %p252_p10 = scmp.ne.s32.totalorder %s466_s3, %s251_s10  ;;  %p255_p11 = scmp.lt.u32.totalorder %s251_s10, %s466_s3 }
  0x39   :  { %p257_p12 = pnand %p255_p11, %p252_p10 }
  0x3b   :  { %260 = shalt.err (!%p257_p12)
}
  0x3c   :  { %s261_s15 = scalar_lea.vmem %s402_s22, 512  ;;  %p266_p0 = scmp.lt.s32.totalorder %s402_s22, %s402_s22 }
  0x3d   :  { %p262_p13 = scmp.ne.s32.totalorder %s402_s22, %s261_s15  ;;  %p267_p1 = scmp.lt.s32.totalorder %s261_s15, %s261_s15 }
  0x3f   :  { %p268_p2 = por %p267_p1, %p266_p0 }
  0x41   :  { %p269_p3 = pnand %p268_p2, %p262_p13 }
  0x43   :  { %272 = shalt.err (!%p269_p3)
}
  0x44   :  { %63 = dma.hbm_to_vmem [thread:$0]  %s466_s3, 512, %s402_s22, [#allocation9], %s329_s30, %s329_s30, %s330_s6  }
  0x45   :  { %317 = dma.done.wait [#allocation3], 640  }
  0x46   :  { %318 = vsyncadd [#allocation3], 4294966656 }
  0x47   :  { %319 = dma.done.wait [#allocation6], 1152  }
  0x48   :  { %320 = vsyncadd [#allocation6], 4294966144 }
  0x49   :  { %321 = dma.done.wait [#allocation9], 512  }
  0x4a   :  { %322 = vsyncadd [#allocation9], 4294966784  ;;  %v79_v0 = vld [vmem:[#allocation2 + $0x8] sm:$0xff]  ;;  %v81_v1 = vld [vmem:[#allocation5 + $0x8] sm:$0xff]  ;;  %s333_s3 = smov [#allocation10]   ;;  %s334_s6 = smov [#allocation11]  }
  0x4b   :  { %v82_v2 = vld [vmem:[#allocation7] sm:$0xff]  ;;  %v95_v7 = vld [vmem:[#allocation5 + $0x10] sm:$0xff]  ;;  %v111_v15 = vld [vmem:[#allocation5 + $0x18] sm:$0xff]  ;;  %s152_s30 = sshll.u32 %s333_s3, 4  ;;  %s162_s1 = sshll.u32 %s334_s6, 4  ;;  %s153_s30 = int_to_ptr.vmem [resolvable:$true] %s152_s30  ;;  %s163_s1 = int_to_ptr.vmem [resolvable:$true] %s162_s1 }
  0x4c   :  { %v83_v3 = vld [vmem:[#allocation8] sm:$0xff]  ;;  %v84_v5 = vmul.f32 %v82_v2, %v79_v0  ;;  %v97_v8 = vld [vmem:[#allocation7 + $0x8] sm:$0xff]  ;;  %v88_v10 = vmul.f32 %v82_v2, %v81_v1  ;;  %v113_v16 = vld [vmem:[#allocation7 + $0x10] sm:$0xff]  ;;  %s273_s17 = scalar_lea.vmem %s153_s30, 128  ;;  %p278_p5 = scmp.lt.s32.totalorder %s153_s30, %s153_s30 }
  0x4d   :  { %v93_v4 = vld [vmem:[#allocation2 + $0x10] sm:$0xff]  ;;  %v85_v6 = vmul.f32 %v83_v3, %v81_v1  ;;  %v99_v9 = vld [vmem:[#allocation8 + $0x8] sm:$0xff]  ;;  %v89_v11 = vmul.f32 %v83_v3, %v79_v0  ;;  %v104_v17 = vmul.f32 %v97_v8, %v95_v7  ;;  %v115_v20 = vld [vmem:[#allocation8 + $0x10] sm:$0xff]  ;;  %v120_v25 = vmul.f32 %v113_v16, %v111_v15  ;;  %p274_p4 = scmp.ne.s32.totalorder %s153_s30, %s273_s17  ;;  %p279_p6 = scmp.lt.s32.totalorder %s273_s17, %s273_s17 }
  0x4e   :  { %v100_v12 = vmul.f32 %v97_v8, %v93_v4  ;;  %v101_v13 = vmul.f32 %v99_v9, %v95_v7  ;;  %v109_v14 = vld [vmem:[#allocation2 + $0x18] sm:$0xff]  ;;  %v105_v18 = vmul.f32 %v99_v9, %v93_v4  ;;  %v125_v22 = vld [vmem:[#allocation2 + $0x20] sm:$0xff]  ;;  %v127_v23 = vld [vmem:[#allocation5 + $0x20] sm:$0xff]  ;;  %v117_v27 = vmul.f32 %v115_v20, %v111_v15 }
  0x4f   :  { %v86_v19 = vsub.f32 %v84_v5, %v85_v6  ;;  %v116_v21 = vmul.f32 %v113_v16, %v109_v14  ;;  %v90_v24 = vadd.f32 %v89_v11, %v88_v10  ;;  %v129_v28 = vld [vmem:[#allocation7 + $0x18] sm:$0xff]  ;;  %v121_v31 = vmul.f32 %v115_v20, %v109_v14  ;;  %v76_v46 = vld [vmem:[#allocation2] sm:$0xff]  ;;  %p280_p7 = por %p279_p6, %p278_p5 }
  0x50   :  { %v102_v26 = vsub.f32 %v100_v12, %v101_v13  ;;  %v131_v29 = vld [vmem:[#allocation8 + $0x18] sm:$0xff]  ;;  %v106_v30 = vadd.f32 %v105_v18, %v104_v17  ;;  %v132_v32 = vmul.f32 %v129_v28, %v125_v22  ;;  %v136_v34 = vmul.f32 %v129_v28, %v127_v23 }
  0x51   :  { %v133_v33 = vmul.f32 %v131_v29, %v127_v23  ;;  %v137_v35 = vmul.f32 %v131_v29, %v125_v22  ;;  %v118_v37 = vsub.f32 %v116_v21, %v117_v27  ;;  %v122_v39 = vadd.f32 %v121_v31, %v120_v25  ;;  %v77_v47 = vld [vmem:[#allocation5] sm:$0xff]  ;;  %p281_p8 = pnand %p280_p7, %p274_p4 }
  0x52   :  { %v103_v36 = vadd.f32 %v102_v26, %v86_v19  ;;  %v107_v38 = vadd.f32 %v106_v30, %v90_v24 }
  0x53   :  { %v134_v40 = vsub.f32 %v132_v32, %v133_v33  ;;  %v138_v41 = vadd.f32 %v137_v35, %v136_v34 }
  0x54   :  { %v119_v42 = vadd.f32 %v118_v37, %v103_v36  ;;  %v123_v43 = vadd.f32 %v122_v39, %v107_v38 }
  0x56   :  { %v135_v44 = vadd.f32 %v134_v40, %v119_v42  ;;  %v139_v45 = vadd.f32 %v138_v41, %v123_v43 }
  0x58   :  { %v140_v48 = vmul.f32 0.276, %v135_v44  ;;  %v143_v49 = vmul.f32 0.276, %v139_v45 }
  0x5a   :  { %v141_v50 = vsub.f32 %v76_v46, %v140_v48  ;;  %v144_v51 = vsub.f32 %v77_v47, %v143_v49 }
  0x5c   :  { %142 = vst [vmem:[#allocation10] sm:$0xff] %v141_v50  ;;  %145 = vst [vmem:[#allocation11] sm:$0xff] %v144_v51 }
  0x5d   :  { %284 = shalt.err (!%p281_p8)
}
  0x5e   :  { %s285_s20 = scalar_lea.hbm %s467_s4, 128 }
  0x5f   :  { %p286_p9 = scmp.ne.s32.totalorder %s467_s4, %s285_s20  ;;  %p289_p10 = scmp.lt.u32.totalorder %s285_s20, %s467_s4 }
  0x61   :  { %p291_p11 = pnand %p289_p10, %p286_p9 }
  0x63   :  { %294 = shalt.err (!%p291_p11)
}
  0x64   :  { %155 = dma.vmem_to_hbm [thread:$0]  %s153_s30, 128, %s467_s4, [#allocation4]  }
  0x65   :  { %s295_s28 = scalar_lea.vmem %s163_s1, 128  ;;  %p300_p13 = scmp.lt.s32.totalorder %s163_s1, %s163_s1 }
  0x66   :  { %p296_p12 = scmp.ne.s32.totalorder %s163_s1, %s295_s28  ;;  %p301_p0 = scmp.lt.s32.totalorder %s295_s28, %s295_s28 }
  0x68   :  { %p302_p1 = por %p301_p0, %p300_p13 }
  0x6a   :  { %p303_p2 = pnand %p302_p1, %p296_p12 }
  0x6c   :  { %306 = shalt.err (!%p303_p2)
}
  0x6d   :  { %s307_s21 = scalar_lea.hbm %s468_s5, 128 }
  0x6e   :  { %p308_p3 = scmp.ne.s32.totalorder %s468_s5, %s307_s21  ;;  %p311_p4 = scmp.lt.u32.totalorder %s307_s21, %s468_s5 }
  0x70   :  { %p313_p5 = pnand %p311_p4, %p308_p3 }
  0x72   :  { %316 = shalt.err (!%p313_p5)
}
  0x73   :  { %165 = dma.vmem_to_hbm [thread:$0]  %s163_s1, 128, %s468_s5, [#allocation12]  }
  0x74   :  { %323 = dma.done.wait [#allocation4], 128  }
  0x75   :  { %324 = vsyncadd [#allocation4], 4294967168 }
  0x76   :  { %325 = dma.done.wait [#allocation12], 128  }
  0x77   :  { %326 = vsyncadd [#allocation12], 4294967168 }
  0x78   :  { %172 = vsyncpa [#allocation3], 1 }
  0x79   :  { %173 = vsyncpa [#allocation6], 1 }
  0x7a   :  { %174 = vsyncpa [#allocation9], 1 }
  0x7b   :  { %175 = vsyncpa [#allocation4], 1 }
  0x7c   :  { %176 = vsyncpa [#allocation12], 1 }

</bundles_post_ra>
